<compile_context>
chip_gen: v5e
topology: v5e:2x2
jax: 0.10.0
libtpu: 0.0.40
codegen_flags: <defaults>
</compile_context>

<pallas_src>
import functools

import jax
import jax.numpy as jnp
from jax.experimental import pallas as pl
from jax.experimental.pallas import tpu as pltpu

_G = 4  # batch rows folded into the lane dimension (block-diagonal packing)


# -----------------------------------------------------------------------------
# Kernel: 4x (Linear -> Tanh), fully fused, all f32. One grid step = one tile
# of packed batch rows; weights/biases are VMEM-resident across all steps.
# -----------------------------------------------------------------------------
def _autoencoder_kernel(x_ref,
                        w1_ref, b1_ref,
                        w2_ref, b2_ref,
                        w3_ref, b3_ref,
                        w4_ref, b4_ref,
                        o_ref):
    def layer(h, w_ref, b_ref):
        acc = jnp.dot(h, w_ref[...], preferred_element_type=jnp.float32)
        return jnp.tanh(acc + b_ref[...])

    h = layer(x_ref[...], w1_ref, b1_ref)   # encoder linear_0 + tanh
    h = layer(h, w2_ref, b2_ref)            # encoder linear_1 + tanh
    h = layer(h, w3_ref, b3_ref)            # decoder linear_0 + tanh
    h = layer(h, w4_ref, b4_ref)            # decoder linear_1 + tanh
    o_ref[...] = h.astype(o_ref.dtype)


# -----------------------------------------------------------------------------
# One-time parameter glue (hoisted out of the per-call forward):
#   PyTorch (out, in) weights -> block-diagonal (G*in, G*out) f32
#   biases                    -> tiled (1, G*out) f32
# Block-diagonal weights keep the G packed batch rows independent, so the lane
# packing is mathematically exact.
# -----------------------------------------------------------------------------
def prepare_params(params, group=_G):
    eye = jnp.eye(group, dtype=jnp.float32)
    prepared = []
    for w_pt, b in params:
        w = jnp.asarray(w_pt, jnp.float32).T                       # (in, out)
        w_blk = jnp.kron(eye, w)                                   # (G*in, G*out)
        b_blk = jnp.tile(jnp.asarray(b, jnp.float32), group).reshape(1, -1)
        prepared.append((w_blk, b_blk))
    return prepared


def _pick_row_tile(rows, cap=2048):
    """Pick a tile (in packed rows) that is a multiple of 8 (f32 sublanes),
    divides the (8-aligned) row count, is large (cap = 2048 packed rows
    ~ 8192 batch rows, a few MiB of VMEM), and leaves >=2 grid blocks when
    possible so v7x's two TensorCores both get work."""
    rp = ((rows + 7) // 8) * 8            # pad rows only when not 8-aligned
    hi = min(cap, rp if rp < 16 else rp // 2)
    tr = 8
    for cand in range(hi, 7, -1):
        if cand % 8 == 0 and rp % cand == 0:
            tr = cand
            break
    return tr, rp


# -----------------------------------------------------------------------------
# Forward wrapper.
# -----------------------------------------------------------------------------
@functools.partial(jax.jit, static_argnames=("group",))
def autoencoder_forward(x, prepared_params, *, group=_G):
    """x: (B, D0) float32. prepared_params: output of prepare_params()."""
    B, D0 = x.shape
    gout = prepared_params[-1][0].shape[1]          # group * D_out
    d_out = gout // group

    # Fold `group` batch rows into the lane axis. Both reshapes are pure
    # row-major views (zero HBM movement); padding only triggers for ragged B.
    Bg = ((B + group - 1) // group) * group
    tr, rp = _pick_row_tile(Bg // group)
    Bp = rp * group

    xp = x
    if Bp != B:
        xp = jnp.pad(x, ((0, Bp - B), (0, 0)))
    xp = xp.reshape(rp, group * D0)

    flat_inputs = [xp]
    in_specs = [pl.BlockSpec((tr, group * D0), lambda i: (i, 0))]
    for w, b in prepared_params:
        flat_inputs += [w, b]
        # Full-array blocks with constant index_map -> stay VMEM-resident.
        in_specs.append(pl.BlockSpec(w.shape, lambda i: (0, 0)))
        in_specs.append(pl.BlockSpec(b.shape, lambda i: (0, 0)))
    out_spec = pl.BlockSpec((tr, gout), lambda i: (i, 0))
    n_blocks = rp // tr

    # Advisory cost estimate (packed / block-diagonal shapes).
    layer_dims = [(w.shape[0], w.shape[1]) for w, _ in prepared_params]
    flops = 2 * rp * sum(din * dout for din, dout in layer_dims)
    transcendentals = rp * sum(dout for _, dout in layer_dims)
    bytes_accessed = (xp.size * 4 + rp * gout * 4
                      + sum(w.size * 4 + b.size * 4 for w, b in prepared_params))

    out = pl.pallas_call(
        _autoencoder_kernel,
        out_shape=jax.ShapeDtypeStruct((rp, gout), jnp.float32),
        grid=(n_blocks,),
        in_specs=in_specs,
        out_specs=out_spec,
        compiler_params=pltpu.CompilerParams(
            dimension_semantics=("parallel",)),      # megacore-shardable on v7x
        cost_estimate=pl.CostEstimate(
            flops=flops,
            transcendentals=transcendentals,
            bytes_accessed=bytes_accessed),
    )(*flat_inputs)

    out = out.reshape(Bp, d_out)                     # pure view
    if Bp != B:
        out = out[:B]
    return out


# -----------------------------------------------------------------------------
# Pure-JAX f32 reference (matches PyTorch semantics) + init helpers.
# -----------------------------------------------------------------------------
def _reference_forward(x, params):
    h = x
    for w_pt, b in params:
        h = jnp.tanh(h @ w_pt.T + b)
    return h


def _init_linear(key, out_dim, in_dim, xavier):
    kw, kb = jax.random.split(key)
    if xavier:
        limit = jnp.sqrt(6.0 / (in_dim + out_dim))
    else:
        limit = jnp.sqrt(1.0 / in_dim)   # PyTorch default-ish bound
    w = jax.random.uniform(kw, (out_dim, in_dim), jnp.float32, -limit, limit)
    b = jax.random.uniform(kb, (out_dim,), jnp.float32, -limit, limit)
    return w, b


if __name__ == "__main__":
    # Structure-preserving small shapes:
    #   Encoder hidden_dim = [32, 16, 8], Decoder hidden_dim = [8, 16, 32]
    B = 64
    enc_dims = [32, 16, 8]
    dec_dims = [8, 16, 32]

    key = jax.random.PRNGKey(0)
    keys = jax.random.split(key, 5)

    params = []
    # Encoder layers (use_xavier=True by default)
    params.append(_init_linear(keys[0], enc_dims[1], enc_dims[0], xavier=True))
    params.append(_init_linear(keys[1], enc_dims[2], enc_dims[1], xavier=True))
    # Decoder layers (use_xavier=False by default -> PyTorch default init)
    params.append(_init_linear(keys[2], dec_dims[1], dec_dims[0], xavier=False))
    params.append(_init_linear(keys[3], dec_dims[2], dec_dims[1], xavier=False))

    x = jax.random.normal(keys[4], (B, enc_dims[0]), jnp.float32)

    prepared = prepare_params(params)            # one-time glue
    out = autoencoder_forward(x, prepared)       # grid of 2 packed-row tiles
    out = jax.block_until_ready(out)

    ref = _reference_forward(x, params)
    assert out.shape == (B, dec_dims[-1])
    # Pure f32 pipeline -> tight tolerance vs. the f32 reference.
    assert jnp.allclose(out, ref, atol=1e-3, rtol=1e-3), \
        float(jnp.max(jnp.abs(out - ref)))

    print("KERNEL_OK")
</pallas_src>

<mosaic_0001>
module attributes {stable_mosaic.version = 11 : i64} {
  func.func @_autoencoder_kernel(%arg0: i32, %arg1: memref<8x128xf32, #tpu.memory_space<vmem>>, %arg2: memref<128x64xf32, #tpu.memory_space<vmem>>, %arg3: memref<1x64xf32, #tpu.memory_space<vmem>>, %arg4: memref<64x32xf32, #tpu.memory_space<vmem>>, %arg5: memref<1x32xf32, #tpu.memory_space<vmem>>, %arg6: memref<32x64xf32, #tpu.memory_space<vmem>>, %arg7: memref<1x64xf32, #tpu.memory_space<vmem>>, %arg8: memref<64x128xf32, #tpu.memory_space<vmem>>, %arg9: memref<1x128xf32, #tpu.memory_space<vmem>>, %arg10: memref<8x128xf32, #tpu.memory_space<vmem>>) attributes {dimension_semantics = [#tpu.dimension_semantics<parallel>], iteration_bounds = array<i64: 2>, scalar_prefetch = 0 : i64, scratch_operands = 0 : i64, tpu.core_type = #tpu.core_type<tc>, window_params = [{transform_indices = @transform_0, window_bounds = array<i64: 8, 128>}, {pipeline_mode = #tpu.pipeline_mode<synchronous>, transform_indices = @transform_1, window_bounds = array<i64: 128, 64>}, {pipeline_mode = #tpu.pipeline_mode<synchronous>, transform_indices = @transform_2, window_bounds = array<i64: 1, 64>}, {pipeline_mode = #tpu.pipeline_mode<synchronous>, transform_indices = @transform_3, window_bounds = array<i64: 64, 32>}, {pipeline_mode = #tpu.pipeline_mode<synchronous>, transform_indices = @transform_4, window_bounds = array<i64: 1, 32>}, {pipeline_mode = #tpu.pipeline_mode<synchronous>, transform_indices = @transform_5, window_bounds = array<i64: 32, 64>}, {pipeline_mode = #tpu.pipeline_mode<synchronous>, transform_indices = @transform_6, window_bounds = array<i64: 1, 64>}, {pipeline_mode = #tpu.pipeline_mode<synchronous>, transform_indices = @transform_7, window_bounds = array<i64: 64, 128>}, {pipeline_mode = #tpu.pipeline_mode<synchronous>, transform_indices = @transform_8, window_bounds = array<i64: 1, 128>}, {transform_indices = @transform_9, window_bounds = array<i64: 8, 128>}]} {
    %c0 = arith.constant 0 : index
    %c0_0 = arith.constant 0 : index
    %0 = vector.load %arg1[%c0, %c0_0] : memref<8x128xf32, #tpu.memory_space<vmem>>, vector<8x128xf32>
    %c0_1 = arith.constant 0 : index
    %c0_2 = arith.constant 0 : index
    %1 = vector.load %arg2[%c0_1, %c0_2] : memref<128x64xf32, #tpu.memory_space<vmem>>, vector<128x64xf32>
    %cst = arith.constant dense<0.000000e+00> : vector<8x64xf32>
    %2 = tpu.matmul %0, %1, %cst {dimension_numbers = #tpu.dot_dimension_numbers<[1], [0], [0], [1], [0, 0, 1, 1], [], []>} : vector<8x128xf32>, vector<128x64xf32>, vector<8x64xf32> -> vector<8x64xf32>
    %c0_3 = arith.constant 0 : index
    %c0_4 = arith.constant 0 : index
    %3 = vector.load %arg3[%c0_3, %c0_4] : memref<1x64xf32, #tpu.memory_space<vmem>>, vector<1x64xf32>
    %4 = vector.broadcast %3 : vector<1x64xf32> to vector<8x64xf32>
    %5 = arith.addf %2, %4 : vector<8x64xf32>
    %6 = math.tanh %5 : vector<8x64xf32>
    %c0_5 = arith.constant 0 : index
    %c0_6 = arith.constant 0 : index
    %7 = vector.load %arg4[%c0_5, %c0_6] : memref<64x32xf32, #tpu.memory_space<vmem>>, vector<64x32xf32>
    %cst_7 = arith.constant dense<0.000000e+00> : vector<8x32xf32>
    %8 = tpu.matmul %6, %7, %cst_7 {dimension_numbers = #tpu.dot_dimension_numbers<[1], [0], [0], [1], [0, 0, 1, 1], [], []>} : vector<8x64xf32>, vector<64x32xf32>, vector<8x32xf32> -> vector<8x32xf32>
    %c0_8 = arith.constant 0 : index
    %c0_9 = arith.constant 0 : index
    %9 = vector.load %arg5[%c0_8, %c0_9] : memref<1x32xf32, #tpu.memory_space<vmem>>, vector<1x32xf32>
    %10 = vector.broadcast %9 : vector<1x32xf32> to vector<8x32xf32>
    %11 = arith.addf %8, %10 : vector<8x32xf32>
    %12 = math.tanh %11 : vector<8x32xf32>
    %c0_10 = arith.constant 0 : index
    %c0_11 = arith.constant 0 : index
    %13 = vector.load %arg6[%c0_10, %c0_11] : memref<32x64xf32, #tpu.memory_space<vmem>>, vector<32x64xf32>
    %cst_12 = arith.constant dense<0.000000e+00> : vector<8x64xf32>
    %14 = tpu.matmul %12, %13, %cst_12 {dimension_numbers = #tpu.dot_dimension_numbers<[1], [0], [0], [1], [0, 0, 1, 1], [], []>} : vector<8x32xf32>, vector<32x64xf32>, vector<8x64xf32> -> vector<8x64xf32>
    %c0_13 = arith.constant 0 : index
    %c0_14 = arith.constant 0 : index
    %15 = vector.load %arg7[%c0_13, %c0_14] : memref<1x64xf32, #tpu.memory_space<vmem>>, vector<1x64xf32>
    %16 = vector.broadcast %15 : vector<1x64xf32> to vector<8x64xf32>
    %17 = arith.addf %14, %16 : vector<8x64xf32>
    %18 = math.tanh %17 : vector<8x64xf32>
    %c0_15 = arith.constant 0 : index
    %c0_16 = arith.constant 0 : index
    %19 = vector.load %arg8[%c0_15, %c0_16] : memref<64x128xf32, #tpu.memory_space<vmem>>, vector<64x128xf32>
    %cst_17 = arith.constant dense<0.000000e+00> : vector<8x128xf32>
    %20 = tpu.matmul %18, %19, %cst_17 {dimension_numbers = #tpu.dot_dimension_numbers<[1], [0], [0], [1], [0, 0, 1, 1], [], []>} : vector<8x64xf32>, vector<64x128xf32>, vector<8x128xf32> -> vector<8x128xf32>
    %c0_18 = arith.constant 0 : index
    %c0_19 = arith.constant 0 : index
    %21 = vector.load %arg9[%c0_18, %c0_19] : memref<1x128xf32, #tpu.memory_space<vmem>>, vector<1x128xf32>
    %22 = vector.broadcast %21 : vector<1x128xf32> to vector<8x128xf32>
    %23 = arith.addf %20, %22 : vector<8x128xf32>
    %24 = math.tanh %23 : vector<8x128xf32>
    %c0_20 = arith.constant 0 : index
    %c0_21 = arith.constant 0 : index
    %25 = vector.load %arg10[%c0_20, %c0_21] : memref<8x128xf32, #tpu.memory_space<vmem>>, vector<8x128xf32>
    tpu.vector_store %arg10[%c0_20, %c0_21], %24 {strides = array<i32>} : memref<8x128xf32, #tpu.memory_space<vmem>>, vector<8x128xf32>,
    return
  }
  func.func @transform_0(%arg0: i32) -> (i32, i32) {
    %c0_i32 = arith.constant 0 : i32
    %c0_i32_0 = arith.constant 0 : i32
    return %arg0, %c0_i32 : i32, i32
  }
  func.func @transform_1(%arg0: i32) -> (i32, i32) {
    %c0_i32 = arith.constant 0 : i32
    %c0_i32_0 = arith.constant 0 : i32
    %c0_i32_1 = arith.constant 0 : i32
    return %c0_i32, %c0_i32_0 : i32, i32
  }
  func.func @transform_2(%arg0: i32) -> (i32, i32) {
    %c0_i32 = arith.constant 0 : i32
    %c0_i32_0 = arith.constant 0 : i32
    %c0_i32_1 = arith.constant 0 : i32
    return %c0_i32, %c0_i32_0 : i32, i32
  }
  func.func @transform_3(%arg0: i32) -> (i32, i32) {
    %c0_i32 = arith.constant 0 : i32
    %c0_i32_0 = arith.constant 0 : i32
    %c0_i32_1 = arith.constant 0 : i32
    return %c0_i32, %c0_i32_0 : i32, i32
  }
  func.func @transform_4(%arg0: i32) -> (i32, i32) {
    %c0_i32 = arith.constant 0 : i32
    %c0_i32_0 = arith.constant 0 : i32
    %c0_i32_1 = arith.constant 0 : i32
    return %c0_i32, %c0_i32_0 : i32, i32
  }
  func.func @transform_5(%arg0: i32) -> (i32, i32) {
    %c0_i32 = arith.constant 0 : i32
    %c0_i32_0 = arith.constant 0 : i32
    %c0_i32_1 = arith.constant 0 : i32
    return %c0_i32, %c0_i32_0 : i32, i32
  }
  func.func @transform_6(%arg0: i32) -> (i32, i32) {
    %c0_i32 = arith.constant 0 : i32
    %c0_i32_0 = arith.constant 0 : i32
    %c0_i32_1 = arith.constant 0 : i32
    return %c0_i32, %c0_i32_0 : i32, i32
  }
  func.func @transform_7(%arg0: i32) -> (i32, i32) {
    %c0_i32 = arith.constant 0 : i32
    %c0_i32_0 = arith.constant 0 : i32
    %c0_i32_1 = arith.constant 0 : i32
    return %c0_i32, %c0_i32_0 : i32, i32
  }
  func.func @transform_8(%arg0: i32) -> (i32, i32) {
    %c0_i32 = arith.constant 0 : i32
    %c0_i32_0 = arith.constant 0 : i32
    %c0_i32_1 = arith.constant 0 : i32
    return %c0_i32, %c0_i32_0 : i32, i32
  }
  func.func @transform_9(%arg0: i32) -> (i32, i32) {
    %c0_i32 = arith.constant 0 : i32
    %c0_i32_0 = arith.constant 0 : i32
    return %arg0, %c0_i32 : i32, i32
  }
}

</mosaic_0001>

<bundles_post_ra>
// kernel: autoencoder_forward.1
= control target key start
LH: loop header
LB: loop body
LE: loop exit
PB: predicated region body
PF: predicated region fallthrough
CT: control target
= control target key end

     0   :  { %s620_s30 = smov 0   ;;  %s770_s0 = inlined_call_operand.vmem [shape: f32[16,128], index: 0, kind: input, shape index: {}]   ;;  %s771_s1 = inlined_call_operand.vmem [shape: f32[128,64], index: 1, kind: input, shape index: {}]   ;;  %s772_s2 = inlined_call_operand.vmem [shape: f32[1,64], index: 2, kind: input, shape index: {}]   ;;  %s773_s3 = inlined_call_operand.vmem [shape: f32[64,32], index: 3, kind: input, shape index: {}]   ;;  %s774_s4 = inlined_call_operand.vmem [shape: f32[1,32], index: 4, kind: input, shape index: {}]   ;;  %s775_s5 = inlined_call_operand.vmem [shape: f32[32,64], index: 5, kind: input, shape index: {}]   ;;  %s776_s6 = inlined_call_operand.vmem [shape: f32[1,64], index: 6, kind: input, shape index: {}]   ;;  %s777_s7 = inlined_call_operand.vmem [shape: f32[64,128], index: 7, kind: input, shape index: {}]   ;;  %s778_s8 = inlined_call_operand.vmem [shape: f32[1,128], index: 8, kind: input, shape index: {}]   ;;  %s779_s9 = inlined_call_operand.vmem [shape: f32[16,128], index: 9, kind: output, shape index: {}]  }
   0x1 LB: > { %s530_s10 = sadd.s32 4294967295, %s568_s30   ;;  %p534_p0 = scmp.ge.s32.totalorder %s568_s30, 1  ;;  %s568_s30 = sphi %s620_s30, %s19_s30  }
   0x2   : > { %p286_p1 = scmp.lt.s32.totalorder %s568_s30, 3 }
   0x4   : > { %p287_p2 = pnand %p534_p0, %p286_p1 }
   0x5   : > { %p320_p3 = scmp.lt.s32.totalorder (!%p287_p2), %s530_s10, 1 }
   0x6   : > { %290 = sbr.rel (%p287_p2) target bundleno = 596 (0x254), region = 56 }
   0xb   : > { %v344_v0 = vld [vmem:[%s771_s1 + $0x78] sm:$0xff]  ;;  %v343_v1 = vld [vmem:[%s771_s1 + $0x70] sm:$0xff]  ;;  %v342_v2 = vld [vmem:[%s771_s1 + $0x68] sm:$0xff]  ;;  %s781_s10 = smov (!%p320_p3, %s530_s10), 1  ;;  %vm382_vm0 = vcmask 523264   ;;  %vm415_vm1 = vcmask 261120  }
   0xc   : > { %349 = vmatpush.msra.mxu0 %v344_v0  ;;  %v341_v3 = vld [vmem:[%s771_s1 + $0x60] sm:$0xff]  ;;  %v377_v4 = vld [vmem:[%s773_s3 + $0x38] sm:$0xff]  ;;  %v376_v5 = vld [vmem:[%s773_s3 + $0x30] sm:$0xff]  ;;  %s535_s24 = sshll.u32 %s781_s10, 3 }
   0xd   : > { %v340_v6 = vld [vmem:[%s771_s1 + $0x58] sm:$0xff]  ;;  %394 = vmatpush.msra.mxu1 %v377_v4  ;;  %v375_v7 = vld [vmem:[%s773_s3 + $0x28] sm:$0xff]  ;;  %v339_v8 = vld [vmem:[%s771_s1 + $0x50] sm:$0xff]  ;;  %s323_s12 = scalar_lea.vmem %s770_s0, %s535_s24  ;;  %s327_s23 = scalar_lea.vmem %s779_s9, %s535_s24 }
   0xe   : > { %350 = vmatpush.msra.mxu0 %v343_v1  ;;  %v338_v9 = vld [vmem:[%s771_s1 + $0x48] sm:$0xff]  ;;  %v337_v10 = vld [vmem:[%s771_s1 + $0x40] sm:$0xff]  ;;  %v336_v11 = vld [vmem:[%s771_s1 + $0x38] sm:$0xff] }
   0xf   : > { %395 = vmatpush.msra.mxu1 %v376_v5  ;;  %v335_v12 = vld [vmem:[%s771_s1 + $0x30] sm:$0xff]  ;;  %v334_v13 = vld [vmem:[%s771_s1 + $0x28] sm:$0xff]  ;;  %v333_v14 = vld [vmem:[%s771_s1 + $0x20] sm:$0xff] }
  0x10   : > { %351 = vmatpush.msra.mxu0 %v342_v2  ;;  %v332_v15 = vld [vmem:[%s771_s1 + $0x18] sm:$0xff]  ;;  %v331_v16 = vld [vmem:[%s771_s1 + $0x10] sm:$0xff]  ;;  %v330_v17 = vld [vmem:[%s771_s1 + $0x8] sm:$0xff] }
  0x11   : > { %396 = vmatpush.msra.mxu1 %v375_v7  ;;  %v329_v18 = vld [vmem:[%s771_s1] sm:$0xff]  ;;  %v373_v21 = vld [vmem:[%s773_s3 + $0x18] sm:$0xff]  ;;  %v372_v22 = vld [vmem:[%s773_s3 + $0x10] sm:$0xff] }
  0x12   : > { %352 = vmatpush.msra.mxu0 %v341_v3  ;;  %v328_v19 = vld [vmem:[%s323_s12] sm:$0xff]  ;;  %v371_v23 = vld [vmem:[%s773_s3 + $0x8] sm:$0xff]  ;;  %v410_v29 = vld [vmem:[%s775_s5 + $0x18] sm:$0xff] }
  0x13   : > { %v374_v20 = vld [vmem:[%s773_s3 + $0x20] sm:$0xff]  ;;  %431 = vmatpush.msra.mxu2 %v410_v29  ;;  %v409_v30 = vld [vmem:[%s775_s5 + $0x10] sm:$0xff]  ;;  %v408_v31 = vld [vmem:[%s775_s5 + $0x8] sm:$0xff] }
  0x14   : > { %353 = vmatpush.msra.mxu0 %v340_v6  ;;  %397 = vmatpush.msra.mxu1 %v374_v20  ;;  %v370_v24 = vld [vmem:[%s773_s3] sm:$0xff]  ;;  %v447_v33 = vld [vmem:[%s777_s7 + $0x38] sm:$0xff]  ;;  %v446_v34 = vld [vmem:[%s777_s7 + $0x30] sm:$0xff] }
  0x15   : > { %v550_v25 = vld [vmem:[%s772_s2] ss:$0 sm:$0xff]  ;;  %432 = vmatpush.msra.mxu2 %v409_v30  ;;  %463 = vmatpush.msra.mxu3 %v447_v33  ;;  %v445_v35 = vld [vmem:[%s777_s7 + $0x28] sm:$0xff]  ;;  %v443_v41 = vld [vmem:[%s777_s7 + $0x18] sm:$0xff] }
  0x16   : > { %354 = vmatpush.msra.mxu0 %v339_v8  ;;  %398 = vmatpush.msra.mxu1 %v373_v21  ;;  %v407_v32 = vld [vmem:[%s775_s5] sm:$0xff]  ;;  %v442_v42 = vld [vmem:[%s777_s7 + $0x10] sm:$0xff]  ;;  %v441_v43 = vld [vmem:[%s777_s7 + $0x8] sm:$0xff] }
  0x17   : > { %433 = vmatpush.msra.mxu2 %v408_v31  ;;  %464 = vmatpush.msra.mxu3 %v446_v34  ;;  %v551_v36 = vld [vmem:[%s774_s4] ss:$0 sm:$0xff] }
  0x18   : > { %355 = vmatpush.msra.mxu0 %v338_v9  ;;  %399 = vmatpush.msra.mxu1 %v372_v22  ;;  %v444_v40 = vld [vmem:[%s777_s7 + $0x20] sm:$0xff] }
  0x19   : > { %434 = vmatpush.msra.mxu2 %v407_v32  ;;  %465 = vmatpush.msra.mxu3 %v445_v35  ;;  %v440_v44 = vld [vmem:[%s777_s7] sm:$0xff] }
  0x1a   : > { %356 = vmatpush.msra.mxu0 %v337_v10  ;;  %400 = vmatpush.msra.mxu1 %v371_v23  ;;  %v552_v45 = vld [vmem:[%s776_s6] ss:$0 sm:$0xff] }
  0x1b   : > { %466 = vmatpush.msra.mxu3 %v444_v40  ;;  %v553_v49 = vld [vmem:[%s778_s8] ss:$0 sm:$0xff] }
  0x1c   : > { %357 = vmatpush.msra.mxu0 %v336_v11  ;;  %401 = vmatpush.msra.mxu1 %v370_v24 }
  0x1d   : > { %467 = vmatpush.msra.mxu3 %v443_v41 }
  0x1e   : > { %358 = vmatpush.msra.mxu0 %v335_v12 }
  0x1f   : > { %468 = vmatpush.msra.mxu3 %v442_v42 }
  0x20   : > { %359 = vmatpush.msra.mxu0 %v334_v13 }
  0x21   : > { %469 = vmatpush.msra.mxu3 %v441_v43 }
  0x22   : > { %360 = vmatpush.msra.mxu0 %v333_v14 }
  0x23   : > { %470 = vmatpush.msra.mxu3 %v440_v44 }
  0x24   : > { %361 = vmatpush.msra.mxu0 %v332_v15 }
  0x26   : > { %362 = vmatpush.msra.mxu0 %v331_v16 }
  0x28   : > { %363 = vmatpush.msra.mxu0 %v330_v17 }
  0x2a   : > { %364 = vmatpush.msra.mxu0 %v329_v18 }
  0x2b   : > { %365 = vmatmul.f32.vlgmr.msra.gmra.mxu0 %v328_v19 }
  0xa8   : > { %v366_v26 = vpop.f32.mrf.mxu0 }
  0xa9   : > { %v367_v27 = vadd.f32 %v550_v25, %v366_v26 }
  0xab   : > { %554 = vtanh.f32 %v367_v27 }
  0xb1   : > { %v555_v28 = vpop.eup %554 }
  0xb2   : > { %537 = vmatmul.msk.f32.vlgmr.msra.gmra.mxu1 %vm382_vm0, %v555_v28 }
 0x12f   : > { %v403_v37 = vpop.f32.mrf.mxu1 }
 0x130   : > { %v404_v38 = vadd.f32 %v551_v36, %v403_v37 }
 0x132   : > { %556 = vtanh.f32 %v404_v38 }
 0x138   : > { %v557_v39 = vpop.eup %556 }
 0x139   : > { %538 = vmatmul.msk.f32.vlgmr.msra.gmra.mxu2 %vm415_vm1, %v557_v39 }
 0x1bc   : > { %v436_v46 = vpop.f32.mrf.mxu2 }
 0x1bd   : > { %v437_v47 = vadd.f32 %v552_v45, %v436_v46 }
 0x1bf   : > { %558 = vtanh.f32 %v437_v47 }
 0x1c5   : > { %v559_v48 = vpop.eup %558 }
 0x1c6   : > { %539 = vmatmul.msk.f32.vlgmr.msra.gmra.mxu3 %vm382_vm0, %v559_v48 }
 0x249   : > { %v472_v50 = vpop.f32.mrf.mxu3 }
 0x24a   : > { %v473_v51 = vadd.f32 %v553_v49, %v472_v50 }
 0x24c   : > { %560 = vtanh.f32 %v473_v51 }
 0x252   : > { %v561_v52 = vpop.eup %560 }
 0x253   : > { %476 = vst [vmem:[%s327_s23] sm:$0xff] %v561_v52 }
 0x254 PF: > { %s19_s30 = sadd.s32 1, %s568_s30  }
 0x255   : > { %p16_p4 = scmp.ge.s32.totalorder %s19_s30, 4  }
 0x257   :  { %18 = sbr.rel (!%p16_p4) target bundleno = 1 (0x1), region = 86 }

</bundles_post_ra>
